<compile_context>
chip_gen: v7x
topology: tpu7x:2x2x1
jax: 0.10.0
libtpu: 0.0.40
codegen_flags: <defaults>
</compile_context>

<pallas_src>
import functools

import jax
import jax.numpy as jnp
from jax import lax
from jax.experimental import pallas as pl
from jax.experimental.pallas import tpu as pltpu

_LANE = 128
_MAX_TILE_ROWS = 512  # rows of 128 lanes per tile (multiple of 32 -> ok for f32/bf16/int8)


def _gdl_kernel(x_ref, t_ref, o_ref, *, tile_rows, valid_rows, needs_mask):
    # x_ref / t_ref: (2, 2, TR, 128) tiles in the native input dtype.
    # o_ref: (8, 128) f32 per-tile partial sum.
    x = x_ref[...].astype(jnp.float32)
    t = t_ref[...].astype(jnp.float32)

    # torch.diff(axis=0) (batch) / torch.diff(axis=1) (channel) on this tile.
    da = (x[1:] - x[:-1]) - (t[1:] - t[:-1])              # (1, 2, TR, 128)
    db = (x[:, 1:] - x[:, :-1]) - (t[:, 1:] - t[:, :-1])  # (2, 1, TR, 128)

    # Per-position partial sums; the broadcast factor 2 (B == C == 2) and the
    # division by numel are applied once in the wrapper.
    acc = jnp.sum(da * da, axis=(0, 1)) + jnp.sum(db * db, axis=(0, 1))  # (TR, 128)

    if needs_mask:
        # Only traced when the row tiling does not divide evenly: zero out the
        # out-of-bounds rows of the final (partial) block via a select, so any
        # garbage (even NaN/inf) in the unpopulated DMA region cannot leak in.
        row0 = pl.program_id(0) * tile_rows
        ridx = row0 + lax.broadcasted_iota(jnp.int32, (tile_rows, 1), 0)
        acc = jnp.where(ridx < valid_rows, acc, 0.0)

    # Fold TR rows down to one (8, 128) vreg with sublane-group-aligned adds
    # (pure VPU; the cross-lane reduce happens once, in the wrapper).
    o_ref[...] = jnp.sum(acc.reshape(tile_rows // 8, 8, _LANE), axis=0)


def gradient_difference_loss(inputs, targets):
    assert inputs.shape == targets.shape, (inputs.shape, targets.shape)
    B, C, H, W = inputs.shape
    # The PyTorch broadcast (B-1,C,H,W) + (B,C-1,H,W) only type-checks for B == C == 2.
    assert B == 2 and C == 2, "GradientDifferenceLoss requires batch == channels == 2"

    numel = B * C * H * W
    hw = H * W

    # Sublane granularity for the native dtype: 8 (f32), 16 (bf16/f16), 32 (int8/fp8).
    itemsize = jnp.dtype(inputs.dtype).itemsize
    sub = 8 * max(1, 4 // itemsize)

    rows = -(-hw // _LANE)                     # cdiv(H*W, 128)
    if rows <= _MAX_TILE_ROWS:
        # Single block: pad rows up to the sublane granule so the in-kernel
        # (TR//8, 8, 128) fold is legal.  The tensor is small here, so the
        # (zero) padding copy is negligible; zero rows contribute 0 to both diffs.
        rows = -(-rows // sub) * sub
        tile_rows = rows
    else:
        # Multi-block: fixed 512-row tiles, partial final block masked in-kernel
        # (no full-tensor pad just to make rows a multiple of the tile).
        tile_rows = _MAX_TILE_ROWS

    num_tiles = -(-rows // tile_rows)
    needs_mask = (rows % tile_rows) != 0
    pad = rows * _LANE - hw

    x = inputs.reshape(B, C, hw)
    t = targets.reshape(B, C, hw)
    if pad:
        # Zero padding along the flattened spatial axis contributes 0 to both diffs.
        x = jnp.pad(x, ((0, 0), (0, 0), (0, pad)))
        t = jnp.pad(t, ((0, 0), (0, 0), (0, pad)))
    x = x.reshape(B, C, rows, _LANE)
    t = t.reshape(B, C, rows, _LANE)

    kernel = functools.partial(
        _gdl_kernel, tile_rows=tile_rows, valid_rows=rows, needs_mask=needs_mask
    )

    in_spec = pl.BlockSpec((B, C, tile_rows, _LANE), lambda i: (0, 0, i, 0))
    partials = pl.pallas_call(
        kernel,
        out_shape=jax.ShapeDtypeStruct((num_tiles * 8, _LANE), jnp.float32),
        grid=(num_tiles,),
        in_specs=[in_spec, in_spec],
        out_specs=pl.BlockSpec((8, _LANE), lambda i: (i, 0)),
        compiler_params=pltpu.CompilerParams(
            dimension_semantics=("parallel",),
            vmem_limit_bytes=32 * 1024 * 1024,
        ),
    )(x, t)

    # Final cross-lane reduce, broadcast factor (B == C == 2), and normalization
    # by the ORIGINAL numel — one tiny XLA op.
    return (2.0 * jnp.sum(partials)) / jnp.float32(numel)


def _reference(inputs, targets):
    da = jnp.diff(inputs, axis=0) - jnp.diff(targets, axis=0)
    db = jnp.diff(inputs, axis=1) - jnp.diff(targets, axis=1)
    return (da**2 + db**2).sum() / inputs.size


if __name__ == "__main__":
    key = jax.random.PRNGKey(0)
    k1, k2 = jax.random.split(key)

    cases = [
        ((2, 2, 16, 16), jnp.float32),    # tiny: single block, lane padding (256 -> 1024)
        ((2, 2, 256, 512), jnp.float32),  # multi-tile grid, evenly divisible (no mask, no pad)
        ((2, 2, 300, 300), jnp.float32),  # multi-tile grid with masked partial final block
        ((2, 2, 40, 56), jnp.bfloat16),   # native sub-32-bit dtype path + padding
    ]
    for shape, dtype in cases:
        inputs = jax.random.normal(k1, shape, dtype=dtype)
        targets = jax.random.normal(k2, shape, dtype=dtype)
        loss = gradient_difference_loss(inputs, targets)
        jax.block_until_ready(loss)
        ref = _reference(inputs.astype(jnp.float32), targets.astype(jnp.float32))
        assert jnp.allclose(loss, ref, rtol=1e-4, atol=1e-6), (shape, dtype, loss, ref)
    print("KERNEL_OK")
</pallas_src>

<mosaic_0001>
module attributes {stable_mosaic.version = 11 : i64} {
  func.func @_gdl_kernel(%arg0: i32, %arg1: memref<2x2x8x128xf32, #tpu.memory_space<vmem>>, %arg2: memref<2x2x8x128xf32, #tpu.memory_space<vmem>>, %arg3: memref<8x128xf32, #tpu.memory_space<vmem>>) attributes {dimension_semantics = [#tpu.dimension_semantics<parallel>], iteration_bounds = array<i64: 1>, scalar_prefetch = 0 : i64, scratch_operands = 0 : i64, tpu.core_type = #tpu.core_type<tc>, window_params = [{transform_indices = @transform_0, window_bounds = array<i64: 2, 2, 8, 128>}, {transform_indices = @transform_1, window_bounds = array<i64: 2, 2, 8, 128>}, {transform_indices = @transform_2, window_bounds = array<i64: 8, 128>}]} {
    %c0 = arith.constant 0 : index
    %c0_0 = arith.constant 0 : index
    %c0_1 = arith.constant 0 : index
    %c0_2 = arith.constant 0 : index
    %0 = vector.load %arg1[%c0, %c0_0, %c0_1, %c0_2] : memref<2x2x8x128xf32, #tpu.memory_space<vmem>>, vector<2x2x8x128xf32>
    %c0_3 = arith.constant 0 : index
    %c0_4 = arith.constant 0 : index
    %c0_5 = arith.constant 0 : index
    %c0_6 = arith.constant 0 : index
    %1 = vector.load %arg2[%c0_3, %c0_4, %c0_5, %c0_6] : memref<2x2x8x128xf32, #tpu.memory_space<vmem>>, vector<2x2x8x128xf32>
    %2 = vector.extract_strided_slice %0 {offsets = [1, 0, 0, 0], sizes = [1, 2, 8, 128], strides = [1, 1, 1, 1]} : vector<2x2x8x128xf32> to vector<1x2x8x128xf32>
    %3 = vector.extract_strided_slice %0 {offsets = [0, 0, 0, 0], sizes = [1, 2, 8, 128], strides = [1, 1, 1, 1]} : vector<2x2x8x128xf32> to vector<1x2x8x128xf32>
    %4 = arith.subf %2, %3 : vector<1x2x8x128xf32>
    %5 = vector.extract_strided_slice %1 {offsets = [1, 0, 0, 0], sizes = [1, 2, 8, 128], strides = [1, 1, 1, 1]} : vector<2x2x8x128xf32> to vector<1x2x8x128xf32>
    %6 = vector.extract_strided_slice %1 {offsets = [0, 0, 0, 0], sizes = [1, 2, 8, 128], strides = [1, 1, 1, 1]} : vector<2x2x8x128xf32> to vector<1x2x8x128xf32>
    %7 = arith.subf %5, %6 : vector<1x2x8x128xf32>
    %8 = arith.subf %4, %7 : vector<1x2x8x128xf32>
    %9 = vector.extract_strided_slice %0 {offsets = [0, 1, 0, 0], sizes = [2, 1, 8, 128], strides = [1, 1, 1, 1]} : vector<2x2x8x128xf32> to vector<2x1x8x128xf32>
    %10 = vector.extract_strided_slice %0 {offsets = [0, 0, 0, 0], sizes = [2, 1, 8, 128], strides = [1, 1, 1, 1]} : vector<2x2x8x128xf32> to vector<2x1x8x128xf32>
    %11 = arith.subf %9, %10 : vector<2x1x8x128xf32>
    %12 = vector.extract_strided_slice %1 {offsets = [0, 1, 0, 0], sizes = [2, 1, 8, 128], strides = [1, 1, 1, 1]} : vector<2x2x8x128xf32> to vector<2x1x8x128xf32>
    %13 = vector.extract_strided_slice %1 {offsets = [0, 0, 0, 0], sizes = [2, 1, 8, 128], strides = [1, 1, 1, 1]} : vector<2x2x8x128xf32> to vector<2x1x8x128xf32>
    %14 = arith.subf %12, %13 : vector<2x1x8x128xf32>
    %15 = arith.subf %11, %14 : vector<2x1x8x128xf32>
    %16 = arith.mulf %8, %8 : vector<1x2x8x128xf32>
    %cst = arith.constant dense<0.000000e+00> : vector<8x128xf32>
    %17 = vector.multi_reduction <add>, %16, %cst [0, 1] : vector<1x2x8x128xf32> to vector<8x128xf32>
    %18 = arith.mulf %15, %15 : vector<2x1x8x128xf32>
    %cst_7 = arith.constant dense<0.000000e+00> : vector<8x128xf32>
    %19 = vector.multi_reduction <add>, %18, %cst_7 [0, 1] : vector<2x1x8x128xf32> to vector<8x128xf32>
    %20 = arith.addf %17, %19 : vector<8x128xf32>
    %21 = vector.shape_cast %20 : vector<8x128xf32> to vector<1x8x128xf32>
    %cst_8 = arith.constant dense<0.000000e+00> : vector<8x128xf32>
    %22 = vector.multi_reduction <add>, %21, %cst_8 [0] : vector<1x8x128xf32> to vector<8x128xf32>
    %c0_9 = arith.constant 0 : index
    %c0_10 = arith.constant 0 : index
    %23 = vector.load %arg3[%c0_9, %c0_10] : memref<8x128xf32, #tpu.memory_space<vmem>>, vector<8x128xf32>
    tpu.vector_store %arg3[%c0_9, %c0_10], %22 {strides = array<i32>} : memref<8x128xf32, #tpu.memory_space<vmem>>, vector<8x128xf32>,
    return
  }
  func.func @transform_0(%arg0: i32) -> (i32, i32, i32, i32) {
    %c0_i32 = arith.constant 0 : i32
    %c0_i32_0 = arith.constant 0 : i32
    %c0_i32_1 = arith.constant 0 : i32
    %c0_i32_2 = arith.constant 0 : i32
    return %c0_i32, %c0_i32_0, %arg0, %c0_i32_1 : i32, i32, i32, i32
  }
  func.func @transform_1(%arg0: i32) -> (i32, i32, i32, i32) {
    %c0_i32 = arith.constant 0 : i32
    %c0_i32_0 = arith.constant 0 : i32
    %c0_i32_1 = arith.constant 0 : i32
    %c0_i32_2 = arith.constant 0 : i32
    return %c0_i32, %c0_i32_0, %arg0, %c0_i32_1 : i32, i32, i32, i32
  }
  func.func @transform_2(%arg0: i32) -> (i32, i32) {
    %c0_i32 = arith.constant 0 : i32
    %c0_i32_0 = arith.constant 0 : i32
    return %arg0, %c0_i32 : i32, i32
  }
}

</mosaic_0001>

<bundles_post_ra>
// kernel: tpu_custom_call.1
= control target key start
LH: loop header
LB: loop body
LE: loop exit
PB: predicated region body
PF: predicated region fallthrough
CT: control target
= control target key end

     0   :  { %7 = vsyncpa [#allocation3], 0  ;;  %s218_s0 = inlined_call_operand.hbm [shape: f32[2,2,8,128], index: 0, kind: input, shape index: {}]   ;;  %s219_s1 = inlined_call_operand.hbm [shape: f32[2,2,8,128], index: 1, kind: input, shape index: {}]   ;;  %s220_s2 = inlined_call_operand.hbm [shape: f32[8,128], index: 2, kind: output, shape index: {}]  }
   0x1   :  { %8 = vsyncpa [#allocation6], 0 }
   0x2   :  { %9 = vsyncpa [#allocation4], 0  ;;  %s162_s9 = smov [#allocation2]   ;;  %s90_s13 = scalar_lea.hbm %s218_s0, 512 }
   0x3   :  { %s15_s10 = sshll.u32 %s162_s9, 4  ;;  %p91_p0 = scmp.ne.s32.totalorder %s218_s0, %s90_s13  ;;  %s16_s10 = int_to_ptr.vmem [resolvable:$true] %s15_s10 }
   0x4   :  { %p94_p1 = scmp.lt.u32.totalorder %s90_s13, %s218_s0 }
   0x6   :  { %p96_p2 = pnand %p94_p1, %p91_p0 }
   0x8   :  { %99 = shalt.err (!%p96_p2)
}
   0x9   :  { %s100_s18 = scalar_lea.vmem %s16_s10, 512  ;;  %p105_p4 = scmp.lt.s32.totalorder %s16_s10, %s16_s10 }
   0xa   :  { %p101_p3 = scmp.ne.s32.totalorder %s16_s10, %s100_s18  ;;  %p106_p5 = scmp.lt.s32.totalorder %s100_s18, %s100_s18 }
   0xc   :  { %p107_p6 = por %p106_p5, %p105_p4 }
   0xe   :  { %p108_p7 = pnand %p107_p6, %p101_p3 }
  0x10   :  { %111 = shalt.err (!%p108_p7)
}
  0x11   :  { %s163_s19 = smov 128   ;;  %s164_s20 = smov 8  }
  0x12   :  { %21 = dma.hbm_to_vmem [thread:$0]  %s218_s0, 512, %s16_s10, [#allocation3], %s163_s19, %s163_s19, %s164_s20  }
  0x13   :  { %s165_s23 = smov [#allocation5]   ;;  %s112_s27 = scalar_lea.hbm %s219_s1, 512 }
  0x14   :  { %s27_s24 = sshll.u32 %s165_s23, 4  ;;  %p113_p8 = scmp.ne.s32.totalorder %s219_s1, %s112_s27  ;;  %s28_s24 = int_to_ptr.vmem [resolvable:$true] %s27_s24 }
  0x15   :  { %p116_p9 = scmp.lt.u32.totalorder %s112_s27, %s219_s1 }
  0x17   :  { %p118_p10 = pnand %p116_p9, %p113_p8 }
  0x19   :  { %121 = shalt.err (!%p118_p10)
}
  0x1a   :  { %s122_s4 = scalar_lea.vmem %s28_s24, 512  ;;  %p127_p12 = scmp.lt.s32.totalorder %s28_s24, %s28_s24 }
  0x1b   :  { %p123_p11 = scmp.ne.s32.totalorder %s28_s24, %s122_s4  ;;  %p128_p13 = scmp.lt.s32.totalorder %s122_s4, %s122_s4 }
  0x1d   :  { %p129_p0 = por %p128_p13, %p127_p12 }
  0x1f   :  { %p130_p1 = pnand %p129_p0, %p123_p11 }
  0x21   :  { %133 = shalt.err (!%p130_p1)
}
  0x22   :  { %33 = dma.hbm_to_vmem [thread:$0]  %s219_s1, 512, %s28_s24, [#allocation6], %s163_s19, %s163_s19, %s164_s20  }
  0x23   :  { %156 = dma.done.wait [#allocation3], 512  }
  0x24   :  { %157 = vsyncadd [#allocation3], 4294966784 }
  0x25   :  { %158 = dma.done.wait [#allocation6], 512  }
  0x26   :  { %159 = vsyncadd [#allocation6], 4294966784  ;;  %v40_v0 = vld [vmem:[#allocation2] sm:$0xff]  ;;  %v41_v1 = vld [vmem:[#allocation2 + $0x8] sm:$0xff]  ;;  %s166_s1 = smov [#allocation7]  }
  0x27   :  { %v42_v2 = vld [vmem:[#allocation2 + $0x10] sm:$0xff]  ;;  %v43_v3 = vld [vmem:[#allocation2 + $0x18] sm:$0xff]  ;;  %v44_v4 = vld [vmem:[#allocation5] sm:$0xff]  ;;  %v54_v7 = vsub.f32 %v41_v1, %v40_v0  ;;  %s75_s6 = sshll.u32 %s166_s1, 4  ;;  %s76_s6 = int_to_ptr.vmem [resolvable:$true] %s75_s6 }
  0x28   :  { %v45_v5 = vld [vmem:[#allocation5 + $0x8] sm:$0xff]  ;;  %v48_v6 = vsub.f32 %v42_v2, %v40_v0  ;;  %v46_v8 = vld [vmem:[#allocation5 + $0x10] sm:$0xff]  ;;  %v47_v9 = vld [vmem:[#allocation5 + $0x18] sm:$0xff]  ;;  %v49_v10 = vsub.f32 %v43_v3, %v41_v1  ;;  %v55_v11 = vsub.f32 %v43_v3, %v42_v2  ;;  %s134_s7 = scalar_lea.vmem %s76_s6, 128  ;;  %p139_p3 = scmp.lt.s32.totalorder %s76_s6, %s76_s6 }
  0x29   :  { %v56_v12 = vsub.f32 %v45_v5, %v44_v4  ;;  %v50_v13 = vsub.f32 %v46_v8, %v44_v4  ;;  %v51_v14 = vsub.f32 %v47_v9, %v45_v5  ;;  %v57_v15 = vsub.f32 %v47_v9, %v46_v8  ;;  %p135_p2 = scmp.ne.s32.totalorder %s76_s6, %s134_s7  ;;  %p140_p4 = scmp.lt.s32.totalorder %s134_s7, %s134_s7 }
  0x2b   :  { %v58_v16 = vsub.f32 %v54_v7, %v56_v12  ;;  %v52_v17 = vsub.f32 %v48_v6, %v50_v13  ;;  %v53_v18 = vsub.f32 %v49_v10, %v51_v14  ;;  %v59_v19 = vsub.f32 %v55_v11, %v57_v15  ;;  %p141_p5 = por %p140_p4, %p139_p3 }
  0x2d   :  { %v63_v20 = vmul.f32 %v58_v16, %v58_v16  ;;  %v60_v21 = vmul.f32 %v52_v17, %v52_v17  ;;  %v61_v22 = vmul.f32 %v53_v18, %v53_v18  ;;  %v64_v23 = vmul.f32 %v59_v19, %v59_v19  ;;  %p142_p6 = pnand %p141_p5, %p135_p2 }
  0x2f   :  { %v62_v24 = vadd.f32 %v61_v22, %v60_v21  ;;  %v65_v25 = vadd.f32 %v64_v23, %v63_v20 }
  0x31   :  { %v66_v26 = vadd.f32 %v65_v25, %v62_v24 }
  0x33   :  { %68 = vst [vmem:[#allocation7] sm:$0xff] %v66_v26 }
  0x34   :  { %145 = shalt.err (!%p142_p6)
}
  0x35   :  { %s146_s10 = scalar_lea.hbm %s220_s2, 128 }
  0x36   :  { %p147_p7 = scmp.ne.s32.totalorder %s220_s2, %s146_s10  ;;  %p150_p8 = scmp.lt.u32.totalorder %s146_s10, %s220_s2 }
  0x38   :  { %p152_p9 = pnand %p150_p8, %p147_p7 }
  0x3a   :  { %155 = shalt.err (!%p152_p9)
}
  0x3b   :  { %78 = dma.vmem_to_hbm [thread:$0]  %s76_s6, 128, %s220_s2, [#allocation4]  }
  0x3c   :  { %160 = dma.done.wait [#allocation4], 128  }
  0x3d   :  { %161 = vsyncadd [#allocation4], 4294967168 }
  0x3e   :  { %82 = vsyncpa [#allocation3], 1 }
  0x3f   :  { %83 = vsyncpa [#allocation6], 1 }
  0x40   :  { %84 = vsyncpa [#allocation4], 1 }

</bundles_post_ra>
